<compile_context>
chip_gen: v5e
topology: v5e:2x2
jax: 0.10.0
libtpu: 0.0.40
codegen_flags: <defaults>
</compile_context>

<pallas_src>
import jax
import jax.numpy as jnp
from jax import lax
from jax.experimental import pallas as pl
from jax.experimental.pallas import tpu as pltpu


# ----------------------------- Pallas kernel --------------------------------

def _patch_conv_kernel(w_ref, p_ref, add_ref, o_ref):
    # w_ref:   (tE, K)        bf16  conv weight tile, K = C*P*P flattened last
    # p_ref:   (bT, K, tNp)   bf16  patch tiles for bT images (K-major)
    # add_ref: (tE, tNp)      f32   bias + scrambled positional embedding
    # o_ref:   (bT, tE, tNp)  bf16  conv output in NCHW-flat order
    w = w_ref[...]
    add = add_ref[...]
    # Static unroll over the per-step batch block (bT is a compile-time const).
    for i in range(p_ref.shape[0]):
        acc = lax.dot_general(
            w, p_ref[i],
            dimension_numbers=(((1,), (0,)), ((), ())),   # native [M,K]x[K,N]
            preferred_element_type=jnp.float32)
        o_ref[i] = (acc + add).astype(o_ref.dtype)


# ------------------------------ wrappers -------------------------------------

def _pick_tile(dim: int) -> int:
    # Prefer large lane-dense (multiple-of-128) tiles; fall back to full extent
    # for small / irregular dims (required: last block dim must be 128-multiple
    # or the full array extent).
    for t in (512, 384, 256, 128):
        if dim % t == 0:
            return t
    # TODO(synk): pad irregular Np (e.g. 196) up to a 128 multiple and mask the
    # tail instead of falling through to an odd full-width block.
    return dim


def _pick_batch_block(batch: int, max_bt: int = 4) -> int:
    for t in range(min(batch, max_bt), 0, -1):
        if batch % t == 0:
            return t
    return 1


def _patchify_conv(w_bf16, patches_bf16, addend_f32, out_dtype=jnp.bfloat16):
    """w: (E,K) bf16, patches: (B,K,Np) bf16, addend: (E,Np) f32 -> (B,E,Np)."""
    B, K, Np = patches_bf16.shape
    E = w_bf16.shape[0]
    tE, tNp = _pick_tile(E), _pick_tile(Np)
    bT = _pick_batch_block(B)
    # Batch is the INNERMOST grid axis: weight (e,0) and addend (e,p) block
    # indices are constant across consecutive steps -> stay VMEM-resident.
    grid = (E // tE, Np // tNp, B // bT)
    return pl.pallas_call(
        _patch_conv_kernel,
        out_shape=jax.ShapeDtypeStruct((B, E, Np), out_dtype),
        grid=grid,
        in_specs=[
            pl.BlockSpec((tE, K), lambda e, p, b: (e, 0)),
            pl.BlockSpec((bT, K, tNp), lambda e, p, b: (b, 0, p)),
            pl.BlockSpec((tE, tNp), lambda e, p, b: (e, p)),
        ],
        out_specs=pl.BlockSpec((bT, tE, tNp), lambda e, p, b: (b, e, p)),
        compiler_params=pltpu.CompilerParams(
            # All axes independent (no reduction); megacore may shard any of
            # them -- per-core iteration order still keeps the weight resident.
            dimension_semantics=("parallel", "parallel", "parallel"),
            vmem_limit_bytes=48 * 1024 * 1024),
    )(w_bf16, patches_bf16, addend_f32)


def patch_embedding_forward(x, conv_w, conv_b, cls_token, pos_embedding,
                            patch_size, out_dtype=jnp.bfloat16):
    """Reproduces PatchEmbedding.forward.

    x:             (B, C, H, W)        NCHW, like PyTorch
    conv_w:        (E, C, P, P)
    conv_b:        (E,)
    cls_token:     (1, 1, E)
    pos_embedding: (1, Np + 1, E)
    returns:       (B, Np + 1, E) in `out_dtype` (bf16 by default; the
                   downstream transformer is assumed to consume bf16).
    """
    B, C, H, W = x.shape
    E = conv_w.shape[0]
    P = patch_size
    Hp, Wp = H // P, W // P
    Np = Hp * Wp
    K = C * P * P

    # --- patch extraction (XLA glue), straight to bf16, laid out (B, K, Np) so
    # the kernel contracts in native [M,K]x[K,N] form (no MXU RHS transpose).
    # TODO(synk): fold this transpose into the kernel's BlockSpec DMA
    # (block (1, C, P, W) per patch-row) to remove the extra image-sized pass.
    patches = x.astype(jnp.bfloat16).reshape(B, C, Hp, P, Wp, P)
    patches = jnp.transpose(patches, (0, 1, 3, 5, 2, 4)).reshape(B, K, Np)

    # --- weight: free reshape (E, C, P, P) -> (E, K); no host-side transpose.
    w2d = conv_w.reshape(E, K).astype(jnp.bfloat16)

    # --- bias + positional embedding folded into the matmul epilogue.
    # PyTorch's raw-memory reshape(B,-1,E) "token scramble" means the tokens in
    # (Np, E) view share memory with the conv output in (E, Np) view, so the
    # pos rows 1.. are pre-scrambled by a free (Np,E)->(E,Np) raw reshape.
    pos = pos_embedding.astype(jnp.float32)
    addend = conv_b.astype(jnp.float32)[:, None] + pos[0, 1:, :].reshape(E, Np)

    # --- hot path: conv-as-matmul + bias + pos, output in NCHW-flat order.
    conv_out = _patchify_conv(w2d, patches, addend, out_dtype)   # (B, E, Np)

    # PyTorch's `X.reshape(B, -1, E)` on the NCHW conv output: a free,
    # contiguous raw reshape (no transpose, no extra HBM pass).
    tokens = conv_out.reshape(B, Np, E)

    # --- cls token (+ its positional embedding) prepended in glue (tiny).
    # TODO(synk): write the cls row + tokens directly into one (B, Np+1, E)
    # pallas output to remove this concatenate's extra HBM read+write pass.
    cls_row = (cls_token.astype(jnp.float32) + pos[:, 0:1, :]).astype(out_dtype)
    cls = jnp.broadcast_to(cls_row, (B, 1, E))
    return jnp.concatenate([cls, tokens], axis=1)                # (B, Np+1, E)


# ----------------------------- reference (JAX) ------------------------------

def patch_embedding_reference(x, conv_w, conv_b, cls_token, pos_embedding,
                              patch_size):
    B = x.shape[0]
    E = conv_w.shape[0]
    y = lax.conv_general_dilated(
        x.astype(jnp.float32), conv_w.astype(jnp.float32),
        window_strides=(patch_size, patch_size), padding="VALID",
        dimension_numbers=("NCHW", "OIHW", "NCHW"))
    y = y + conv_b.reshape(1, E, 1, 1)
    y = y.reshape(B, -1, E)                                   # same raw reshape
    cls = jnp.broadcast_to(cls_token, (B, 1, E))
    y = jnp.concatenate([cls, y], axis=1)
    return y + pos_embedding


# --------------------------------- main --------------------------------------

if __name__ == "__main__":
    B, C, IMG, P, E = 2, 4, 16, 4, 32
    Np = (IMG // P) ** 2          # 16 patches

    key = jax.random.PRNGKey(0)
    k_x, k_w, k_b, k_cls, k_pos = jax.random.split(key, 5)

    x = jax.random.normal(k_x, (B, C, IMG, IMG), dtype=jnp.float32)
    conv_w = jax.random.normal(k_w, (E, C, P, P), dtype=jnp.float32) * 0.05
    conv_b = jax.random.normal(k_b, (E,), dtype=jnp.float32) * 0.05
    cls_token = jax.random.normal(k_cls, (1, 1, E), dtype=jnp.float32)
    pos_embedding = jax.random.uniform(k_pos, (1, Np + 1, E), dtype=jnp.float32)

    out = patch_embedding_forward(x, conv_w, conv_b, cls_token, pos_embedding, P)
    out = jax.block_until_ready(out)

    ref = patch_embedding_reference(x, conv_w, conv_b, cls_token,
                                    pos_embedding, P)
    assert out.shape == (B, Np + 1, E)
    # bf16 MXU operands + bf16 output writeback (f32 accumulation / epilogue)
    # -> loosened tolerance vs the f32 reference.
    assert jnp.allclose(out.astype(jnp.float32), ref, atol=3e-2, rtol=3e-2), \
        "mismatch vs reference"

    print("KERNEL_OK")
</pallas_src>

<mosaic_0001>
module attributes {stable_mosaic.version = 11 : i64} {
  func.func @_patch_conv_kernel(%arg0: i32, %arg1: i32, %arg2: i32, %arg3: memref<32x64xbf16, #tpu.memory_space<vmem>>, %arg4: memref<2x64x16xbf16, #tpu.memory_space<vmem>>, %arg5: memref<32x16xf32, #tpu.memory_space<vmem>>, %arg6: memref<2x32x16xbf16, #tpu.memory_space<vmem>>) attributes {dimension_semantics = [#tpu.dimension_semantics<parallel>, #tpu.dimension_semantics<parallel>, #tpu.dimension_semantics<parallel>], iteration_bounds = array<i64: 1, 1, 1>, scalar_prefetch = 0 : i64, scratch_operands = 0 : i64, tpu.core_type = #tpu.core_type<tc>, window_params = [{transform_indices = @transform_0, window_bounds = array<i64: 32, 64>}, {transform_indices = @transform_1, window_bounds = array<i64: 2, 64, 16>}, {transform_indices = @transform_2, window_bounds = array<i64: 32, 16>}, {transform_indices = @transform_3, window_bounds = array<i64: 2, 32, 16>}]} {
    %c0 = arith.constant 0 : index
    %c0_0 = arith.constant 0 : index
    %0 = vector.load %arg3[%c0, %c0_0] : memref<32x64xbf16, #tpu.memory_space<vmem>>, vector<32x64xbf16>
    %c0_1 = arith.constant 0 : index
    %c0_2 = arith.constant 0 : index
    %1 = vector.load %arg5[%c0_1, %c0_2] : memref<32x16xf32, #tpu.memory_space<vmem>>, vector<32x16xf32>
    %c0_3 = arith.constant 0 : index
    %c0_4 = arith.constant 0 : index
    %c0_5 = arith.constant 0 : index
    %2 = vector.load %arg4[%c0_3, %c0_4, %c0_5] : memref<2x64x16xbf16, #tpu.memory_space<vmem>>, vector<1x64x16xbf16>
    %3 = vector.shape_cast %2 : vector<1x64x16xbf16> to vector<64x16xbf16>
    %cst = arith.constant dense<0.000000e+00> : vector<32x16xf32>
    %4 = tpu.matmul %0, %3, %cst {dimension_numbers = #tpu.dot_dimension_numbers<[1], [0], [0], [1], [0, 0, 1, 1], [], []>} : vector<32x64xbf16>, vector<64x16xbf16>, vector<32x16xf32> -> vector<32x16xf32>
    %5 = arith.addf %4, %1 : vector<32x16xf32>
    %6 = arith.truncf %5 : vector<32x16xf32> to vector<32x16xbf16>
    %c0_6 = arith.constant 0 : index
    %c0_7 = arith.constant 0 : index
    %c0_8 = arith.constant 0 : index
    %7 = vector.load %arg6[%c0_6, %c0_7, %c0_8] : memref<2x32x16xbf16, #tpu.memory_space<vmem>>, vector<1x32x16xbf16>
    %8 = vector.shape_cast %7 : vector<1x32x16xbf16> to vector<32x16xbf16>
    %9 = vector.shape_cast %6 : vector<32x16xbf16> to vector<1x32x16xbf16>
    tpu.vector_store %arg6[%c0_6, %c0_7, %c0_8], %9 {strides = array<i32>} : memref<2x32x16xbf16, #tpu.memory_space<vmem>>, vector<1x32x16xbf16>,
    %c1 = arith.constant 1 : index
    %c0_9 = arith.constant 0 : index
    %c0_10 = arith.constant 0 : index
    %10 = vector.load %arg4[%c1, %c0_9, %c0_10] : memref<2x64x16xbf16, #tpu.memory_space<vmem>>, vector<1x64x16xbf16>
    %11 = vector.shape_cast %10 : vector<1x64x16xbf16> to vector<64x16xbf16>
    %cst_11 = arith.constant dense<0.000000e+00> : vector<32x16xf32>
    %12 = tpu.matmul %0, %11, %cst_11 {dimension_numbers = #tpu.dot_dimension_numbers<[1], [0], [0], [1], [0, 0, 1, 1], [], []>} : vector<32x64xbf16>, vector<64x16xbf16>, vector<32x16xf32> -> vector<32x16xf32>
    %13 = arith.addf %12, %1 : vector<32x16xf32>
    %14 = arith.truncf %13 : vector<32x16xf32> to vector<32x16xbf16>
    %c1_12 = arith.constant 1 : index
    %c0_13 = arith.constant 0 : index
    %c0_14 = arith.constant 0 : index
    %15 = vector.load %arg6[%c1_12, %c0_13, %c0_14] : memref<2x32x16xbf16, #tpu.memory_space<vmem>>, vector<1x32x16xbf16>
    %16 = vector.shape_cast %15 : vector<1x32x16xbf16> to vector<32x16xbf16>
    %17 = vector.shape_cast %14 : vector<32x16xbf16> to vector<1x32x16xbf16>
    tpu.vector_store %arg6[%c1_12, %c0_13, %c0_14], %17 {strides = array<i32>} : memref<2x32x16xbf16, #tpu.memory_space<vmem>>, vector<1x32x16xbf16>,
    return
  }
  func.func @transform_0(%arg0: i32, %arg1: i32, %arg2: i32) -> (i32, i32) {
    %c0_i32 = arith.constant 0 : i32
    %c0_i32_0 = arith.constant 0 : i32
    return %arg0, %c0_i32 : i32, i32
  }
  func.func @transform_1(%arg0: i32, %arg1: i32, %arg2: i32) -> (i32, i32, i32) {
    %c0_i32 = arith.constant 0 : i32
    %c0_i32_0 = arith.constant 0 : i32
    return %arg2, %c0_i32, %arg1 : i32, i32, i32
  }
  func.func @transform_2(%arg0: i32, %arg1: i32, %arg2: i32) -> (i32, i32) {
    %c0_i32 = arith.constant 0 : i32
    return %arg0, %arg1 : i32, i32
  }
  func.func @transform_3(%arg0: i32, %arg1: i32, %arg2: i32) -> (i32, i32, i32) {
    %c0_i32 = arith.constant 0 : i32
    return %arg2, %arg0, %arg1 : i32, i32, i32
  }
}

</mosaic_0001>

<bundles_post_ra>
// kernel: tpu_custom_call.1
= control target key start
LH: loop header
LB: loop body
LE: loop exit
PB: predicated region body
PF: predicated region fallthrough
CT: control target
= control target key end

     0   :  { %vm65_vm0 = vcmask 523264   ;;  %vm95_vm1 = vcmask 125952   ;;  %s333_s1 = inlined_call_operand.vmem [shape: bf16[2,64,16], index: 1, kind: input, shape index: {}]   ;;  %s334_s0 = inlined_call_operand.vmem [shape: bf16[32,64], index: 0, kind: input, shape index: {}]   ;;  %s335_s2 = inlined_call_operand.vmem [shape: f32[32,16], index: 2, kind: input, shape index: {}]   ;;  %s336_s3 = inlined_call_operand.vmem [shape: bf16[2,32,16], index: 3, kind: output, shape index: {}]  }
   0x1   :  { %v226_v0 = vld [vmem:[%s333_s1 + $0x18] sm:$0xff]  ;;  %v225_v2 = vld [vmem:[%s333_s1 + $0x10] sm:$0xff]  ;;  %v224_v4 = vld [vmem:[%s333_s1 + $0x8] sm:$0xff] }
   0x2   :  { %v230_v1 = vld [vmem:[%s333_s1 + $0x38] sm:$0xff]  ;;  %76 = vmatpush.bf16.msra.mxu0 %v226_v0  ;;  %231 = vmatpush.bf16.msra.mxu2 %v226_v0  ;;  %v229_v3 = vld [vmem:[%s333_s1 + $0x30] sm:$0xff]  ;;  %v228_v5 = vld [vmem:[%s333_s1 + $0x28] sm:$0xff] }
   0x3   :  { %137 = vmatpush.bf16.msra.mxu1 %v230_v1  ;;  %235 = vmatpush.bf16.msra.mxu3 %v230_v1  ;;  %v223_v6 = vld [vmem:[%s333_s1] sm:$0xff]  ;;  %v222_v9 = vld [vmem:[%s334_s0 + $0x8] sm:$0xff]  ;;  %v21_v17 = vld [vmem:[%s335_s2 + $0x10] sm:$0xff] }
   0x4   :  { %v227_v7 = vld [vmem:[%s333_s1 + $0x20] sm:$0xff]  ;;  %v20_v19 = vld [vmem:[%s335_s2 + $0x8] sm:$0xff]  ;;  %v22_v31 = vld [vmem:[%s335_s2 + $0x18] sm:$0xff] }
   0x5   :  { %v221_v8 = vld [vmem:[%s334_s0] sm:$0xff] }
   0x6   :  { %77 = vmatpush.bf16.msra.mxu0 %v225_v2  ;;  %232 = vmatpush.bf16.msra.mxu2 %v225_v2  ;;  %v19_v10 = vld [vmem:[%s335_s2] sm:$0xff] }
   0x7   :  { %138 = vmatpush.bf16.msra.mxu1 %v229_v3  ;;  %236 = vmatpush.bf16.msra.mxu3 %v229_v3 }
   0xa   :  { %78 = vmatpush.bf16.msra.mxu0 %v224_v4  ;;  %233 = vmatpush.bf16.msra.mxu2 %v224_v4 }
   0xb   :  { %139 = vmatpush.bf16.msra.mxu1 %v228_v5  ;;  %237 = vmatpush.bf16.msra.mxu3 %v228_v5 }
   0xe   :  { %79 = vmatpush.bf16.msra.mxu0 %v223_v6  ;;  %234 = vmatpush.bf16.msra.mxu2 %v223_v6 }
   0xf   :  { %140 = vmatpush.bf16.msra.mxu1 %v227_v7  ;;  %238 = vmatpush.bf16.msra.mxu3 %v227_v7 }
  0x11   :  { %189 = vmatmul.msk.bf16.vlgmr.msra.gmra.mxu0 %vm65_vm0, %v221_v8  ;;  %190 = vmatmul.msk.bf16.vlgmr.msra.gmra.mxu2 %vm65_vm0, %v222_v9 }
  0x12   :  { %215 = vmatmul.msk.bf16.vlgmr.msra.gmra.mxu1 %vm65_vm0, %v221_v8  ;;  %216 = vmatmul.msk.bf16.vlgmr.msra.gmra.mxu3 %vm65_vm0, %v222_v9 }
  0x8e   :  { %v81_v11 = vpop.f32.mrf.mxu0 }
  0x8f   :  { %v82_v12 = vadd.f32 %v81_v11, %v19_v10  ;;  %v142_v13 = vpop.f32.mrf.mxu1 }
  0x90   :  { %v143_v14 = vadd.f32 %v142_v13, %v19_v10 }
  0x91   :  { %v91_v15 = vpack.c.bf16 %v82_v12, %v82_v12 }
  0x92   :  { %v152_v16 = vpack.c.bf16 %v143_v14, %v143_v14 }
  0x93   :  { %96 = vst.msk [vmem:[%s336_s3] sm:$0xf] %vm95_vm1, %v91_v15 }
  0x94   :  { %217 = vst.msk [vmem:[%s336_s3 + $0x10] sm:$0xf] %vm95_vm1, %v152_v16  ;;  %v86_v18 = vpop.f32.mrf.mxu2 }
  0x95   :  { %v87_v20 = vadd.f32 %v86_v18, %v21_v17  ;;  %v147_v21 = vpop.f32.mrf.mxu3 }
  0x96   :  { %v148_v22 = vadd.f32 %v147_v21, %v21_v17  ;;  %v83_v23 = vpop.f32.mrf.mxu0 }
  0x97   :  { %v93_v24 = vpack.c.bf16 %v87_v20, %v87_v20  ;;  %v84_v25 = vadd.f32 %v83_v23, %v20_v19  ;;  %v144_v26 = vpop.f32.mrf.mxu1 }
  0x98   :  { %v154_v27 = vpack.c.bf16 %v148_v22, %v148_v22  ;;  %v145_v28 = vadd.f32 %v144_v26, %v20_v19 }
  0x99   :  { %98 = vst.msk [vmem:[%s336_s3 + $0x8] sm:$0xf] %vm95_vm1, %v93_v24  ;;  %v92_v29 = vpack.c.bf16 %v84_v25, %v84_v25 }
  0x9a   :  { %219 = vst.msk [vmem:[%s336_s3 + $0x18] sm:$0xf] %vm95_vm1, %v154_v27  ;;  %v153_v30 = vpack.c.bf16 %v145_v28, %v145_v28 }
  0x9b   :  { %97 = vst.msk [vmem:[%s336_s3 + $0x4] sm:$0xf] %vm95_vm1, %v92_v29 }
  0x9c   :  { %218 = vst.msk [vmem:[%s336_s3 + $0x14] sm:$0xf] %vm95_vm1, %v153_v30  ;;  %v88_v32 = vpop.f32.mrf.mxu2 }
  0x9d   :  { %v89_v33 = vadd.f32 %v88_v32, %v22_v31  ;;  %v149_v34 = vpop.f32.mrf.mxu3 }
  0x9e   :  { %v150_v35 = vadd.f32 %v149_v34, %v22_v31 }
  0x9f   :  { %v94_v36 = vpack.c.bf16 %v89_v33, %v89_v33 }
  0xa0   :  { %v155_v37 = vpack.c.bf16 %v150_v35, %v150_v35 }
  0xa1   :  { %99 = vst.msk [vmem:[%s336_s3 + $0xc] sm:$0xf] %vm95_vm1, %v94_v36 }
  0xa2   :  { %220 = vst.msk [vmem:[%s336_s3 + $0x1c] sm:$0xf] %vm95_vm1, %v155_v37 }

</bundles_post_ra>
